<compile_context>
chip_gen: v5e
topology: v5e:2x2
jax: 0.10.0
libtpu: 0.0.40
codegen_flags: <defaults>
</compile_context>

<pallas_src>
import jax
import jax.numpy as jnp
from jax.experimental import pallas as pl
from jax.experimental.pallas import tpu as pltpu


def _round_up(x, m):
    return (x + m - 1) // m * m


# ---------------------------------------------------------------------------
# Kernels
# ---------------------------------------------------------------------------
def _fused_two_head_kernel(x_ref, w_ref, b_ref, span_ref, word_ref):
    # x_ref:    (tm, K)     original dtype; cast to f32 exactly once (`.float()`)
    # w_ref:    (K, 2*Np)   f32, [fc^T | fc_vis^T], N zero-padded to Np
    # b_ref:    (1, 2*Np)   f32
    # span_ref: (tm, Np)    f32, lane-dense
    # word_ref: (tm, Np)    f32, lane-dense
    x = x_ref[...].astype(jnp.float32)
    res = jnp.dot(x, w_ref[...], preferred_element_type=jnp.float32) + b_ref[...]
    half = span_ref.shape[-1]            # Np, a multiple of 128 -> aligned split
    span_ref[...] = res[:, :half]
    word_ref[...] = res[:, half:]


def _col_tiled_kernel(x_ref, w_ref, b_ref, out_ref):
    # Fallback (huge weights): grid = (row tiles, column tiles over 2*Np).
    x = x_ref[...].astype(jnp.float32)
    out_ref[...] = (
        jnp.dot(x, w_ref[...], preferred_element_type=jnp.float32) + b_ref[...]
    )


# ---------------------------------------------------------------------------
# Wrapper
# ---------------------------------------------------------------------------
def _vmem_budget_bytes():
    """Generation-aware VMEM budget (~65% of physical per-TC VMEM)."""
    cap = None
    try:
        info = pltpu.get_tpu_info()
        cap = getattr(info, "vmem_capacity_bytes", None)
    except Exception:
        cap = None
    if not cap:
        return 40 * (1 << 20)            # safe on every generation (incl. v7x)
    return int(cap * 0.65)


def image_encoder_forward(obj_feats, fc_w, fc_b, fc_vis_w, fc_vis_b, *, tm=1024):
    """Pallas equivalent of ImageEncoder.forward.

    obj_feats: [..., input_size]
    fc_w, fc_vis_w: [size, input_size]   (PyTorch nn.Linear weight layout)
    fc_b, fc_vis_b: [size]
    returns (features_span, features_word), each [..., size], float32.
    """
    input_size = obj_feats.shape[-1]
    size = fc_w.shape[0]
    lead_shape = obj_feats.shape[:-1]

    x2d = obj_feats.reshape(-1, input_size)      # original dtype, NO padding
    M = x2d.shape[0]
    if M == 0:                                   # degenerate: empty batch
        z = jnp.zeros((*lead_shape, size), jnp.float32)
        return z, z

    x_itemsize = jnp.dtype(x2d.dtype).itemsize
    K = input_size                               # full-extent block dim
    Np = _round_up(size, 128)                    # lane-aligned per-head N
    Ncat = 2 * Np

    # ---- fused weight / bias prep (tiny; only N is zero-padded) -----------
    def prep_w(w):
        wt = w.astype(jnp.float32).T             # [K, size]
        return jnp.pad(wt, ((0, 0), (0, Np - size)))

    def prep_b(b):
        return jnp.pad(b.astype(jnp.float32), (0, Np - size))

    w_cat = jnp.concatenate([prep_w(fc_w), prep_w(fc_vis_w)], axis=1)  # [K, 2Np]
    b_cat = jnp.concatenate([prep_b(fc_b), prep_b(fc_vis_b)]).reshape(1, Ncat)

    budget = _vmem_budget_bytes()
    m_ceil = _round_up(M, 8)

    # ---- row tile ----------------------------------------------------------
    tm = max(8, min(_round_up(tm, 8), m_ceil))
    # Give multi-TensorCore chips (v7x) at least 2 row-grid steps to split;
    # the extra ~0.35us/step is negligible at this size on single-TC chips.
    if M >= 256:
        tm = min(tm, _round_up(pl.cdiv(M, 2), 8))

    def fused_vmem(tm_):
        x_tile = tm_ * K * x_itemsize
        out_tile = tm_ * Np * 4
        w_bytes = K * Ncat * 4
        b_bytes = Ncat * 4
        tmp = tm_ * K * 4 + tm_ * Ncat * 4       # in-kernel f32 cast + dot result
        # 2x for double-buffering (weights are grid-invariant but counted
        # conservatively; see header note about pl.Buffered(1)).
        return 2 * x_tile + 2 * 2 * out_tile + 2 * (w_bytes + b_bytes) + tmp

    while fused_vmem(tm) > budget and tm > 8:
        tm = max(8, _round_up(tm // 2, 8))

    flops = 2 * M * K * Ncat
    bytes_accessed = (M * K * x_itemsize      # x, read once
                      + K * Ncat * 4          # fused weights
                      + Ncat * 4              # fused bias
                      + M * Ncat * 4)         # two f32 outputs
    cost = pl.CostEstimate(flops=flops, transcendentals=0,
                           bytes_accessed=bytes_accessed)

    if fused_vmem(tm) <= budget:
        # ---- fast path: one fused MXU matmul per row tile, two outputs ----
        grid = (pl.cdiv(M, tm),)
        vmem_limit = max(int(fused_vmem(tm)) + 8 * (1 << 20), 32 * (1 << 20))

        span_p, word_p = pl.pallas_call(
            _fused_two_head_kernel,
            out_shape=(jax.ShapeDtypeStruct((M, Np), jnp.float32),
                       jax.ShapeDtypeStruct((M, Np), jnp.float32)),
            grid_spec=pltpu.PrefetchScalarGridSpec(
                num_scalar_prefetch=0,
                grid=grid,
                in_specs=[
                    pl.BlockSpec((tm, K), lambda i: (i, 0)),      # x (streamed)
                    pl.BlockSpec((K, Ncat), lambda i: (0, 0)),    # fused W^T
                    pl.BlockSpec((1, Ncat), lambda i: (0, 0)),    # fused bias
                ],
                out_specs=[
                    pl.BlockSpec((tm, Np), lambda i: (i, 0)),     # span head
                    pl.BlockSpec((tm, Np), lambda i: (i, 0)),     # word head
                ],
            ),
            compiler_params=pltpu.CompilerParams(
                dimension_semantics=("parallel",),
                vmem_limit_bytes=vmem_limit,
            ),
            cost_estimate=cost,
        )(x2d, w_cat, b_cat)
    else:
        # ---- fallback: fused weight too large for VMEM -> tile columns ----
        tn = 128
        for cand in range(Ncat, 127, -128):       # largest /128 divisor of Ncat
            if Ncat % cand:
                continue
            if 2 * (K * cand * 4 + cand * 4) <= budget // 2:
                tn = cand
                break

        tm = max(8, min(_round_up(1024, 8), m_ceil))
        if M >= 256:
            tm = min(tm, _round_up(pl.cdiv(M, 2), 8))

        def tiled_vmem(tm_):
            return (2 * tm_ * K * x_itemsize + 2 * tm_ * tn * 4
                    + 2 * (K * tn * 4 + tn * 4)
                    + tm_ * K * 4 + tm_ * tn * 4)

        while tiled_vmem(tm) > budget and tm > 8:
            tm = max(8, _round_up(tm // 2, 8))

        vmem_limit = max(int(tiled_vmem(tm)) + 8 * (1 << 20), 32 * (1 << 20))

        out_cat = pl.pallas_call(
            _col_tiled_kernel,
            out_shape=jax.ShapeDtypeStruct((M, Ncat), jnp.float32),
            grid_spec=pltpu.PrefetchScalarGridSpec(
                num_scalar_prefetch=0,
                grid=(pl.cdiv(M, tm), Ncat // tn),
                in_specs=[
                    pl.BlockSpec((tm, K), lambda i, j: (i, 0)),
                    pl.BlockSpec((K, tn), lambda i, j: (0, j)),
                    pl.BlockSpec((1, tn), lambda i, j: (0, j)),
                ],
                out_specs=pl.BlockSpec((tm, tn), lambda i, j: (i, j)),
            ),
            compiler_params=pltpu.CompilerParams(
                dimension_semantics=("parallel", "parallel"),
                vmem_limit_bytes=vmem_limit,
            ),
            cost_estimate=cost,
        )(x2d, w_cat, b_cat)
        span_p = out_cat[:, :Np]
        word_p = out_cat[:, Np:]

    # ---- epilogue: only a lane trim when size is not a multiple of 128 ----
    if Np != size:
        span_p = span_p[:, :size]
        word_p = word_p[:, :size]
    features_span = span_p.reshape(*lead_shape, size)
    features_word = word_p.reshape(*lead_shape, size)
    return features_span, features_word


if __name__ == "__main__":
    key = jax.random.PRNGKey(0)
    k_x, k_w1, k_b1, k_w2, k_b2 = jax.random.split(key, 5)

    batch, num_objs = 2, 8
    input_size, size = 32, 32

    # Input object features [B, N, input_size]
    obj_feats = jax.random.normal(k_x, (batch, num_objs, input_size),
                                  dtype=jnp.float32)

    # Deterministic parameter init (module shapes; see NOTE in the header).
    fc_w = jax.random.normal(k_w1, (size, input_size), dtype=jnp.float32) * 0.05
    fc_b = jax.random.normal(k_b1, (size,), dtype=jnp.float32) * 0.05
    fc_vis_w = jax.random.normal(k_w2, (size, input_size), dtype=jnp.float32) * 0.05
    fc_vis_b = jax.random.normal(k_b2, (size,), dtype=jnp.float32) * 0.05

    span, word = image_encoder_forward(obj_feats, fc_w, fc_b,
                                       fc_vis_w, fc_vis_b)
    jax.block_until_ready((span, word))

    # Pure-JAX reference check.
    ref_span = obj_feats.astype(jnp.float32) @ fc_w.T + fc_b
    ref_word = obj_feats.astype(jnp.float32) @ fc_vis_w.T + fc_vis_b
    assert span.shape == (batch, num_objs, size)
    assert word.shape == (batch, num_objs, size)
    assert jnp.allclose(span, ref_span, atol=1e-5)
    assert jnp.allclose(word, ref_word, atol=1e-5)

    print("KERNEL_OK")
</pallas_src>

<mosaic_0001>
module attributes {stable_mosaic.version = 11 : i64} {
  func.func @_fused_two_head_kernel(%arg0: i32, %arg1: memref<16x32xf32, #tpu.memory_space<vmem>>, %arg2: memref<32x256xf32, #tpu.memory_space<vmem>>, %arg3: memref<1x256xf32, #tpu.memory_space<vmem>>, %arg4: memref<16x128xf32, #tpu.memory_space<vmem>>, %arg5: memref<16x128xf32, #tpu.memory_space<vmem>>) attributes {dimension_semantics = [#tpu.dimension_semantics<parallel>], iteration_bounds = array<i64: 1>, scalar_prefetch = 0 : i64, scratch_operands = 0 : i64, tpu.core_type = #tpu.core_type<tc>, window_params = [{transform_indices = @transform_0, window_bounds = array<i64: 16, 32>}, {pipeline_mode = #tpu.pipeline_mode<synchronous>, transform_indices = @transform_1, window_bounds = array<i64: 32, 256>}, {pipeline_mode = #tpu.pipeline_mode<synchronous>, transform_indices = @transform_2, window_bounds = array<i64: 1, 256>}, {transform_indices = @transform_3, window_bounds = array<i64: 16, 128>}, {transform_indices = @transform_4, window_bounds = array<i64: 16, 128>}]} {
    %c0 = arith.constant 0 : index
    %c0_0 = arith.constant 0 : index
    %0 = vector.load %arg1[%c0, %c0_0] : memref<16x32xf32, #tpu.memory_space<vmem>>, vector<16x32xf32>
    %c0_1 = arith.constant 0 : index
    %c0_2 = arith.constant 0 : index
    %1 = vector.load %arg2[%c0_1, %c0_2] : memref<32x256xf32, #tpu.memory_space<vmem>>, vector<32x256xf32>
    %cst = arith.constant dense<0.000000e+00> : vector<16x256xf32>
    %2 = tpu.matmul %0, %1, %cst {dimension_numbers = #tpu.dot_dimension_numbers<[1], [0], [0], [1], [0, 0, 1, 1], [], []>} : vector<16x32xf32>, vector<32x256xf32>, vector<16x256xf32> -> vector<16x256xf32>
    %c0_3 = arith.constant 0 : index
    %c0_4 = arith.constant 0 : index
    %3 = vector.load %arg3[%c0_3, %c0_4] : memref<1x256xf32, #tpu.memory_space<vmem>>, vector<1x256xf32>
    %4 = vector.broadcast %3 : vector<1x256xf32> to vector<16x256xf32>
    %5 = arith.addf %2, %4 : vector<16x256xf32>
    %6 = vector.extract_strided_slice %5 {offsets = [0, 0], sizes = [16, 128], strides = [1, 1]} : vector<16x256xf32> to vector<16x128xf32>
    %c0_5 = arith.constant 0 : index
    %c0_6 = arith.constant 0 : index
    %7 = vector.load %arg4[%c0_5, %c0_6] : memref<16x128xf32, #tpu.memory_space<vmem>>, vector<16x128xf32>
    tpu.vector_store %arg4[%c0_5, %c0_6], %6 {strides = array<i32>} : memref<16x128xf32, #tpu.memory_space<vmem>>, vector<16x128xf32>,
    %8 = vector.extract_strided_slice %5 {offsets = [0, 128], sizes = [16, 128], strides = [1, 1]} : vector<16x256xf32> to vector<16x128xf32>
    %c0_7 = arith.constant 0 : index
    %c0_8 = arith.constant 0 : index
    %9 = vector.load %arg5[%c0_7, %c0_8] : memref<16x128xf32, #tpu.memory_space<vmem>>, vector<16x128xf32>
    tpu.vector_store %arg5[%c0_7, %c0_8], %8 {strides = array<i32>} : memref<16x128xf32, #tpu.memory_space<vmem>>, vector<16x128xf32>,
    return
  }
  func.func @transform_0(%arg0: i32) -> (i32, i32) {
    %c0_i32 = arith.constant 0 : i32
    %c0_i32_0 = arith.constant 0 : i32
    return %arg0, %c0_i32 : i32, i32
  }
  func.func @transform_1(%arg0: i32) -> (i32, i32) {
    %c0_i32 = arith.constant 0 : i32
    %c0_i32_0 = arith.constant 0 : i32
    %c0_i32_1 = arith.constant 0 : i32
    return %c0_i32, %c0_i32_0 : i32, i32
  }
  func.func @transform_2(%arg0: i32) -> (i32, i32) {
    %c0_i32 = arith.constant 0 : i32
    %c0_i32_0 = arith.constant 0 : i32
    %c0_i32_1 = arith.constant 0 : i32
    return %c0_i32, %c0_i32_0 : i32, i32
  }
  func.func @transform_3(%arg0: i32) -> (i32, i32) {
    %c0_i32 = arith.constant 0 : i32
    %c0_i32_0 = arith.constant 0 : i32
    return %arg0, %c0_i32 : i32, i32
  }
  func.func @transform_4(%arg0: i32) -> (i32, i32) {
    %c0_i32 = arith.constant 0 : i32
    %c0_i32_0 = arith.constant 0 : i32
    return %arg0, %c0_i32 : i32, i32
  }
}

</mosaic_0001>

<bundles_post_ra>
// kernel: tpu_custom_call.1
= control target key start
LH: loop header
LB: loop body
LE: loop exit
PB: predicated region body
PF: predicated region fallthrough
CT: control target
= control target key end

     0   :  { %10 = vsyncpa [#allocation3], 0  ;;  %s381_s0 = inlined_call_operand.hbm [shape: f32[16,32], index: 0, kind: input, shape index: {}]   ;;  %s382_s1 = inlined_call_operand.hbm [shape: f32[32,256], index: 1, kind: input, shape index: {}]   ;;  %s383_s2 = inlined_call_operand.hbm [shape: f32[1,256], index: 2, kind: input, shape index: {}]   ;;  %s384_s3 = inlined_call_operand.hbm [shape: f32[16,128], index: 3, kind: output, shape index: {0}]   ;;  %s385_s4 = inlined_call_operand.hbm [shape: f32[16,128], index: 4, kind: output, shape index: {1}]  }
   0x1   :  { %11 = vsyncpa [#allocation6], 0 }
   0x2   :  { %12 = vsyncpa [#allocation4], 0  ;;  %s31_s17 = sshll.u32 %s382_s1, 4  ;;  %s32_s17 = int_to_ptr.hbm [resolvable:$true] %s31_s17 }
   0x3   :  { %13 = vsyncpa [#allocation10], 0  ;;  %s323_s18 = smov [#allocation5]   ;;  %s18_s22 = sshll.u32 %s381_s0, 4  ;;  %s19_s22 = int_to_ptr.hbm [resolvable:$true] %s18_s22 }
   0x4   :  { %s33_s19 = sshll.u32 %s323_s18, 4  ;;  %s324_s23 = smov 256   ;;  %s34_s19 = int_to_ptr.vmem [resolvable:$true] %s33_s19 }
   0x5   :  { %s325_s24 = smov 16   ;;  %s326_s25 = smov [#allocation2]  }
   0x6   :  { %39 = dma.hbm_to_vmem [thread:$0]  %s32_s17, 1024, %s34_s19, [#allocation6], %s324_s23, %s324_s23, %s325_s24  }
   0x7   :  { %s20_s26 = sshll.u32 %s326_s25, 4  ;;  %s327_s27 = smov 128   ;;  %s21_s26 = int_to_ptr.vmem [resolvable:$true] %s20_s26 }
   0x8   :  { %s328_s28 = smov 8   ;;  %s45_s30 = sshll.u32 %s383_s2, 4  ;;  %s46_s30 = int_to_ptr.hbm [resolvable:$true] %s45_s30 }
   0x9   :  { %26 = dma.hbm_to_vmem [thread:$0]  %s19_s22, 256, %s21_s26, [#allocation3], %s327_s27, %s327_s27, %s328_s28  }
   0xa   :  { %s329_s5 = smov [#allocation7]  }
   0xb   :  { %s47_s0 = sshll.u32 %s329_s5, 4  ;;  %s48_s0 = int_to_ptr.vmem [resolvable:$true] %s47_s0 }
   0xc   :  { %50 = dma.hbm_to_vmem [thread:$0]  %s46_s30, 32, %s48_s0, [#allocation6]  }
   0xd   :  { %315 = dma.done.wait [#allocation3], 256  }
   0xe   :  { %316 = vsyncadd [#allocation3], 4294967040 }
   0xf   :  { %317 = dma.done.wait [#allocation6], 1056  }
  0x10   :  { %318 = vsyncadd [#allocation6], 4294966240  ;;  %v71_v0 = vld [vmem:[#allocation5 + $0x30] sm:$0xff]  ;;  %v72_v1 = vld [vmem:[#allocation5 + $0x38] sm:$0xff]  ;;  %vm79_vm0 = vcmask 261120   ;;  %s330_s2 = smov [#allocation8]  }
  0x11   :  { %v69_v2 = vld [vmem:[#allocation5 + $0x20] sm:$0xff]  ;;  %178 = vmatpush.msra.mxu2 %v71_v0  ;;  %182 = vmatpush.msra.mxu3 %v72_v1  ;;  %v70_v3 = vld [vmem:[#allocation5 + $0x28] sm:$0xff]  ;;  %v67_v4 = vld [vmem:[#allocation5 + $0x10] sm:$0xff]  ;;  %s140_s6 = sshll.u32 %s330_s2, 4  ;;  %s142_s9 = sshll.u32 %s384_s3, 4  ;;  %s141_s6 = int_to_ptr.vmem [resolvable:$true] %s140_s6  ;;  %s143_s9 = int_to_ptr.hbm [resolvable:$true] %s142_s9 }
  0x12   :  { %v68_v5 = vld [vmem:[#allocation5 + $0x18] sm:$0xff]  ;;  %98 = vmatpush.msra.mxu0 %v71_v0  ;;  %121 = vmatpush.msra.mxu1 %v72_v1  ;;  %v65_v6 = vld [vmem:[#allocation5] sm:$0xff]  ;;  %v66_v7 = vld [vmem:[#allocation5 + $0x8] sm:$0xff]  ;;  %s331_s10 = smov [#allocation9]   ;;  %s155_s14 = sshll.u32 %s385_s4, 4  ;;  %s156_s14 = int_to_ptr.hbm [resolvable:$true] %s155_s14 }
  0x13   :  { %179 = vmatpush.msra.mxu2 %v69_v2  ;;  %183 = vmatpush.msra.mxu3 %v70_v3  ;;  %v64_v8 = vld [vmem:[#allocation2 + $0x8] sm:$0xff]  ;;  %v63_v9 = vld [vmem:[#allocation2] sm:$0xff]  ;;  %v73_v10 = vld [vmem:[#allocation7] sm:$0x3]  ;;  %s153_s11 = sshll.u32 %s331_s10, 4  ;;  %s154_s11 = int_to_ptr.vmem [resolvable:$true] %s153_s11 }
  0x14   :  { %99 = vmatpush.msra.mxu0 %v69_v2  ;;  %122 = vmatpush.msra.mxu1 %v70_v3  ;;  %v75_v11 = vperm.slane %v73_v10, 0  ;;  %v76_v12 = vperm.slane %v73_v10, 1 }
  0x15   :  { %180 = vmatpush.msra.mxu2 %v67_v4  ;;  %184 = vmatpush.msra.mxu3 %v68_v5 }
  0x16   :  { %100 = vmatpush.msra.mxu0 %v67_v4  ;;  %123 = vmatpush.msra.mxu1 %v68_v5 }
  0x17   :  { %181 = vmatpush.msra.mxu2 %v65_v6  ;;  %185 = vmatpush.msra.mxu3 %v66_v7 }
  0x18   :  { %175 = vmatmul.msk.f32.vlgmr.msra.gmra.mxu2 %vm79_vm0, %v64_v8  ;;  %177 = vmatmul.msk.f32.vlgmr.msra.gmra.mxu3 %vm79_vm0, %v64_v8 }
  0x19   :  { %101 = vmatpush.msra.mxu0 %v65_v6  ;;  %124 = vmatpush.msra.mxu1 %v66_v7 }
  0x1a   :  { %174 = vmatmul.msk.f32.vlgmr.msra.gmra.mxu0 %vm79_vm0, %v63_v9  ;;  %176 = vmatmul.msk.f32.vlgmr.msra.gmra.mxu1 %vm79_vm0, %v63_v9 }
  0x97   :  { %v103_v13 = vpop.f32.mrf.mxu0  ;;  %v126_v14 = vpop.f32.mrf.mxu1 }
  0x98   :  { %v104_v15 = vadd.f32 %v103_v13, %v75_v11  ;;  %v127_v16 = vadd.f32 %v126_v14, %v76_v12 }
  0x9a   :  { %132 = vst [vmem:[#allocation8] sm:$0xff] %v104_v15 }
  0x9b   :  { %v106_v17 = vpop.f32.mrf.mxu2  ;;  %134 = vst [vmem:[#allocation9] sm:$0xff] %v127_v16  ;;  %v129_v18 = vpop.f32.mrf.mxu3 }
  0x9c   :  { %v107_v19 = vadd.f32 %v106_v17, %v75_v11  ;;  %v130_v20 = vadd.f32 %v129_v18, %v76_v12 }
  0x9e   :  { %133 = vst [vmem:[#allocation8 + $0x8] sm:$0xff] %v107_v19 }
  0x9f   :  { %135 = vst [vmem:[#allocation9 + $0x8] sm:$0xff] %v130_v20  ;;  %148 = dma.vmem_to_hbm [thread:$0]  %s141_s6, 256, %s143_s9, [#allocation4], %s327_s27, %s327_s27, %s328_s28  }
  0xa0   :  { %161 = dma.vmem_to_hbm [thread:$0]  %s154_s11, 256, %s156_s14, [#allocation10], %s327_s27, %s327_s27, %s328_s28  }
  0xa1   :  { %319 = dma.done.wait [#allocation4], 256  }
  0xa2   :  { %320 = vsyncadd [#allocation4], 4294967040 }
  0xa3   :  { %321 = dma.done.wait [#allocation10], 256  }
  0xa4   :  { %322 = vsyncadd [#allocation10], 4294967040 }
  0xa5   :  { %170 = vsyncpa [#allocation3], 1 }
  0xa6   :  { %171 = vsyncpa [#allocation6], 1 }
  0xa7   :  { %172 = vsyncpa [#allocation4], 1 }
  0xa8   :  { %173 = vsyncpa [#allocation10], 1 }

</bundles_post_ra>
